<compile_context>
chip_gen: v5e
topology: v5e:2x2
jax: 0.10.0
libtpu: 0.0.40
codegen_flags: <defaults>
</compile_context>

<pallas_src>
import jax
import jax.numpy as jnp
from jax.experimental import pallas as pl
from jax.experimental.pallas import tpu as pltpu


# ------------------------------------------------------------------------------ kernels

def _reparam_fused_kernel(x_ref, noise_ref, o_ref):
    """x_ref = [mean | logvar] tile (TR, 2H); o = mean + exp(logvar) * 0.5 * eps.

    Used when H % 128 == 0 so both halves are lane-aligned static slices.
    """
    h = o_ref.shape[-1]
    mean = x_ref[:, :h]
    logvar = x_ref[:, h:]
    o_ref[...] = mean + jnp.exp(logvar) * 0.5 * noise_ref[...]


def _reparam_split_kernel(mean_ref, logvar_ref, noise_ref, o_ref):
    """Fallback for lane-misaligned H: mean/logvar are pre-split in the wrapper."""
    o_ref[...] = mean_ref[...] + jnp.exp(logvar_ref[...]) * 0.5 * noise_ref[...]


# ----------------------------------------------------------------------- tiling helpers

def _round_up(x, m):
    return ((x + m - 1) // m) * m


def _choose_tile_rows(r, h):
    """Pick a row-tile size: big (up to 1024 rows) but with double-buffered live bytes
    (~32 * TR * H for f32 in+noise+out) kept well under the scoped VMEM limit on every
    generation (v5e 16 MiB default, v7x 64 MiB physical)."""
    tr = min(1024, _round_up(r, 8))
    budget = 8 * 1024 * 1024          # conservative live-bytes target
    while tr > 8 and 32 * tr * h > budget:
        tr //= 2
    return max(8, _round_up(tr, 8))


# --------------------------------------------------------------------------- pallas call

def _reparam_call(x, noise, tile_rows=None):
    """x: (R, 2H) [mean|logvar], noise: (R, H) -> (R, H) sample, row-tiled + pipelined."""
    r, d = x.shape
    assert d % 2 == 0, "feature dim must be even to chunk into mean/logvar"
    h = d // 2
    assert noise.shape == (r, h)

    tr = _choose_tile_rows(r, h) if tile_rows is None else tile_rows
    grid = (pl.cdiv(r, tr),)

    cost = pl.CostEstimate(
        flops=3 * r * h,                        # mul, mul, add per output element
        transcendentals=r * h,                  # exp per output element
        bytes_accessed=4 * (r * d + 2 * r * h),
    )
    cparams = pltpu.CompilerParams(
        dimension_semantics=("parallel",),      # shard row tiles across TCs on v7x
        vmem_limit_bytes=32 * 1024 * 1024,
    )

    if h % 128 == 0:
        # Lane-aligned: keep the chunk inside the kernel (no wrapper-side copies).
        return pl.pallas_call(
            _reparam_fused_kernel,
            grid=grid,
            in_specs=[pl.BlockSpec((tr, d), lambda i: (i, 0)),
                      pl.BlockSpec((tr, h), lambda i: (i, 0))],
            out_specs=pl.BlockSpec((tr, h), lambda i: (i, 0)),
            out_shape=jax.ShapeDtypeStruct((r, h), jnp.float32),
            compiler_params=cparams,
            cost_estimate=cost,
        )(x, noise)

    # Lane-misaligned H: split in the wrapper (one extra copy) rather than emitting
    # misaligned in-kernel slices / masked partial stores.
    mean, logvar = x[:, :h], x[:, h:]
    return pl.pallas_call(
        _reparam_split_kernel,
        grid=grid,
        in_specs=[pl.BlockSpec((tr, h), lambda i: (i, 0)),
                  pl.BlockSpec((tr, h), lambda i: (i, 0)),
                  pl.BlockSpec((tr, h), lambda i: (i, 0))],
        out_specs=pl.BlockSpec((tr, h), lambda i: (i, 0)),
        out_shape=jax.ShapeDtypeStruct((r, h), jnp.float32),
        compiler_params=cparams,
        cost_estimate=cost,
    )(mean, logvar, noise)


# ----------------------------------------------------------------------------- forward

def parameterize_forward(feats, emb, key, tile_rows=None):
    """JAX/Pallas equivalent of parameterize.forward(g, emb).

    feats : dict {ntype: (N_i, D)}  (== g.ndata['feat'])
    emb   : (E, D_e)
    Returns (dict {ntype: (N_i, D//2)}, (E, D_e//2)).

    One pallas_call per tensor: no concatenate before the kernel and no slicing after,
    so the only HBM traffic is the kernel's own reads/writes.
    """
    ntype_keys = list(feats.keys())
    new_feats = {}
    for idx, k in enumerate(ntype_keys):
        x = feats[k]
        h = x.shape[-1] // 2
        noise = jax.random.normal(jax.random.fold_in(key, idx),
                                  (x.shape[0], h), dtype=jnp.float32)
        new_feats[k] = _reparam_call(x, noise, tile_rows)

    h_e = emb.shape[-1] // 2
    noise_e = jax.random.normal(jax.random.fold_in(key, len(ntype_keys)),
                                (emb.shape[0], h_e), dtype=jnp.float32)
    new_emb = _reparam_call(emb, noise_e, tile_rows)
    return new_feats, new_emb


# --------------------------------------------------------------------- pure-JAX reference

def parameterize_ref(feats, emb, key):
    """Plain-jnp reference with the identical per-tensor noise stream."""
    ntype_keys = list(feats.keys())
    new_feats = {}
    for idx, k in enumerate(ntype_keys):
        x = feats[k]
        h = x.shape[-1] // 2
        mean, logvar = x[:, :h], x[:, h:]
        noise = jax.random.normal(jax.random.fold_in(key, idx),
                                  mean.shape, dtype=jnp.float32)
        new_feats[k] = mean + jnp.exp(logvar) * 0.5 * noise
    h_e = emb.shape[-1] // 2
    mean_e, logvar_e = emb[:, :h_e], emb[:, h_e:]
    noise_e = jax.random.normal(jax.random.fold_in(key, len(ntype_keys)),
                                mean_e.shape, dtype=jnp.float32)
    new_emb = mean_e + jnp.exp(logvar_e) * 0.5 * noise_e
    return new_feats, new_emb


# --------------------------------------------------------------------------------- main

if __name__ == "__main__":
    master = jax.random.PRNGKey(0)
    k_a, k_b, k_emb, k_sample = jax.random.split(master, 4)

    D = 256                          # even feature dim -> mean/logvar halves of 128 (lane-dense)
    N_NODES = {"a": 48, "b": 32}     # two node types (rows kept multiples of 8)
    N_EMB_ROWS = 16                  # one embedding row per canonical edge type
    TILE_ROWS = 16                   # small demo tile so the row grid (pipelining) is exercised

    feats0 = {
        "a": jax.random.normal(k_a, (N_NODES["a"], D), dtype=jnp.float32),
        "b": jax.random.normal(k_b, (N_NODES["b"], D), dtype=jnp.float32),
    }
    emb0 = jax.random.normal(k_emb, (N_EMB_ROWS, D), dtype=jnp.float32)

    fwd = jax.jit(lambda f, e, k: parameterize_forward(f, e, k, tile_rows=TILE_ROWS))
    new_feats, new_emb = fwd(feats0, emb0, k_sample)
    jax.block_until_ready((new_feats, new_emb))

    # shape checks (chunk(2, -1) halves the feature dim)
    assert new_feats["a"].shape == (N_NODES["a"], D // 2)
    assert new_feats["b"].shape == (N_NODES["b"], D // 2)
    assert new_emb.shape == (N_EMB_ROWS, D // 2)

    # numerical check against the pure-JAX reference (identical noise stream)
    ref_feats, ref_emb = parameterize_ref(feats0, emb0, k_sample)
    for k in feats0:
        assert jnp.allclose(new_feats[k], ref_feats[k], atol=1e-5, rtol=1e-5)
    assert jnp.allclose(new_emb, ref_emb, atol=1e-5, rtol=1e-5)

    print("KERNEL_OK")
</pallas_src>

<mosaic_0001>
module attributes {stable_mosaic.version = 11 : i64} {
  func.func @_reparam_fused_kernel(%arg0: i32, %arg1: memref<16x256xf32, #tpu.memory_space<vmem>>, %arg2: memref<16x128xf32, #tpu.memory_space<vmem>>, %arg3: memref<16x128xf32, #tpu.memory_space<vmem>>) attributes {dimension_semantics = [#tpu.dimension_semantics<parallel>], iteration_bounds = array<i64: 3>, scalar_prefetch = 0 : i64, scratch_operands = 0 : i64, tpu.core_type = #tpu.core_type<tc>, window_params = [{transform_indices = @transform_0, window_bounds = array<i64: 16, 256>}, {transform_indices = @transform_1, window_bounds = array<i64: 16, 128>}, {transform_indices = @transform_2, window_bounds = array<i64: 16, 128>}]} {
    %c0 = arith.constant 0 : index
    %c0_0 = arith.constant 0 : index
    %0 = vector.load %arg1[%c0, %c0_0] : memref<16x256xf32, #tpu.memory_space<vmem>>, vector<16x128xf32>
    %c0_1 = arith.constant 0 : index
    %c128 = arith.constant 128 : index
    %1 = vector.load %arg1[%c0_1, %c128] : memref<16x256xf32, #tpu.memory_space<vmem>>, vector<16x128xf32>
    %2 = math.exp %1 : vector<16x128xf32>
    %cst = arith.constant 5.000000e-01 : f32
    %3 = vector.broadcast %cst : f32 to vector<16x128xf32>
    %4 = arith.mulf %2, %3 : vector<16x128xf32>
    %c0_2 = arith.constant 0 : index
    %c0_3 = arith.constant 0 : index
    %5 = vector.load %arg2[%c0_2, %c0_3] : memref<16x128xf32, #tpu.memory_space<vmem>>, vector<16x128xf32>
    %6 = arith.mulf %4, %5 : vector<16x128xf32>
    %7 = arith.addf %0, %6 : vector<16x128xf32>
    %c0_4 = arith.constant 0 : index
    %c0_5 = arith.constant 0 : index
    %8 = vector.load %arg3[%c0_4, %c0_5] : memref<16x128xf32, #tpu.memory_space<vmem>>, vector<16x128xf32>
    tpu.vector_store %arg3[%c0_4, %c0_5], %7 {strides = array<i32>} : memref<16x128xf32, #tpu.memory_space<vmem>>, vector<16x128xf32>,
    return
  }
  func.func @transform_0(%arg0: i32) -> (i32, i32) {
    %c0_i32 = arith.constant 0 : i32
    %c0_i32_0 = arith.constant 0 : i32
    return %arg0, %c0_i32 : i32, i32
  }
  func.func @transform_1(%arg0: i32) -> (i32, i32) {
    %c0_i32 = arith.constant 0 : i32
    %c0_i32_0 = arith.constant 0 : i32
    return %arg0, %c0_i32 : i32, i32
  }
  func.func @transform_2(%arg0: i32) -> (i32, i32) {
    %c0_i32 = arith.constant 0 : i32
    %c0_i32_0 = arith.constant 0 : i32
    return %arg0, %c0_i32 : i32, i32
  }
}

module attributes {stable_mosaic.version = 11 : i64} {
  func.func @_reparam_fused_kernel(%arg0: i32, %arg1: memref<16x256xf32, #tpu.memory_space<vmem>>, %arg2: memref<16x128xf32, #tpu.memory_space<vmem>>, %arg3: memref<16x128xf32, #tpu.memory_space<vmem>>) attributes {dimension_semantics = [#tpu.dimension_semantics<parallel>], iteration_bounds = array<i64: 2>, scalar_prefetch = 0 : i64, scratch_operands = 0 : i64, tpu.core_type = #tpu.core_type<tc>, window_params = [{transform_indices = @transform_0, window_bounds = array<i64: 16, 256>}, {transform_indices = @transform_1, window_bounds = array<i64: 16, 128>}, {transform_indices = @transform_2, window_bounds = array<i64: 16, 128>}]} {
    %c0 = arith.constant 0 : index
    %c0_0 = arith.constant 0 : index
    %0 = vector.load %arg1[%c0, %c0_0] : memref<16x256xf32, #tpu.memory_space<vmem>>, vector<16x128xf32>
    %c0_1 = arith.constant 0 : index
    %c128 = arith.constant 128 : index
    %1 = vector.load %arg1[%c0_1, %c128] : memref<16x256xf32, #tpu.memory_space<vmem>>, vector<16x128xf32>
    %2 = math.exp %1 : vector<16x128xf32>
    %cst = arith.constant 5.000000e-01 : f32
    %3 = vector.broadcast %cst : f32 to vector<16x128xf32>
    %4 = arith.mulf %2, %3 : vector<16x128xf32>
    %c0_2 = arith.constant 0 : index
    %c0_3 = arith.constant 0 : index
    %5 = vector.load %arg2[%c0_2, %c0_3] : memref<16x128xf32, #tpu.memory_space<vmem>>, vector<16x128xf32>
    %6 = arith.mulf %4, %5 : vector<16x128xf32>
    %7 = arith.addf %0, %6 : vector<16x128xf32>
    %c0_4 = arith.constant 0 : index
    %c0_5 = arith.constant 0 : index
    %8 = vector.load %arg3[%c0_4, %c0_5] : memref<16x128xf32, #tpu.memory_space<vmem>>, vector<16x128xf32>
    tpu.vector_store %arg3[%c0_4, %c0_5], %7 {strides = array<i32>} : memref<16x128xf32, #tpu.memory_space<vmem>>, vector<16x128xf32>,
    return
  }
  func.func @transform_0(%arg0: i32) -> (i32, i32) {
    %c0_i32 = arith.constant 0 : i32
    %c0_i32_0 = arith.constant 0 : i32
    return %arg0, %c0_i32 : i32, i32
  }
  func.func @transform_1(%arg0: i32) -> (i32, i32) {
    %c0_i32 = arith.constant 0 : i32
    %c0_i32_0 = arith.constant 0 : i32
    return %arg0, %c0_i32 : i32, i32
  }
  func.func @transform_2(%arg0: i32) -> (i32, i32) {
    %c0_i32 = arith.constant 0 : i32
    %c0_i32_0 = arith.constant 0 : i32
    return %arg0, %c0_i32 : i32, i32
  }
}

module attributes {stable_mosaic.version = 11 : i64} {
  func.func @_reparam_fused_kernel(%arg0: i32, %arg1: memref<16x256xf32, #tpu.memory_space<vmem>>, %arg2: memref<16x128xf32, #tpu.memory_space<vmem>>, %arg3: memref<16x128xf32, #tpu.memory_space<vmem>>) attributes {dimension_semantics = [#tpu.dimension_semantics<parallel>], iteration_bounds = array<i64: 1>, scalar_prefetch = 0 : i64, scratch_operands = 0 : i64, tpu.core_type = #tpu.core_type<tc>, window_params = [{transform_indices = @transform_0, window_bounds = array<i64: 16, 256>}, {transform_indices = @transform_1, window_bounds = array<i64: 16, 128>}, {transform_indices = @transform_2, window_bounds = array<i64: 16, 128>}]} {
    %c0 = arith.constant 0 : index
    %c0_0 = arith.constant 0 : index
    %0 = vector.load %arg1[%c0, %c0_0] : memref<16x256xf32, #tpu.memory_space<vmem>>, vector<16x128xf32>
    %c0_1 = arith.constant 0 : index
    %c128 = arith.constant 128 : index
    %1 = vector.load %arg1[%c0_1, %c128] : memref<16x256xf32, #tpu.memory_space<vmem>>, vector<16x128xf32>
    %2 = math.exp %1 : vector<16x128xf32>
    %cst = arith.constant 5.000000e-01 : f32
    %3 = vector.broadcast %cst : f32 to vector<16x128xf32>
    %4 = arith.mulf %2, %3 : vector<16x128xf32>
    %c0_2 = arith.constant 0 : index
    %c0_3 = arith.constant 0 : index
    %5 = vector.load %arg2[%c0_2, %c0_3] : memref<16x128xf32, #tpu.memory_space<vmem>>, vector<16x128xf32>
    %6 = arith.mulf %4, %5 : vector<16x128xf32>
    %7 = arith.addf %0, %6 : vector<16x128xf32>
    %c0_4 = arith.constant 0 : index
    %c0_5 = arith.constant 0 : index
    %8 = vector.load %arg3[%c0_4, %c0_5] : memref<16x128xf32, #tpu.memory_space<vmem>>, vector<16x128xf32>
    tpu.vector_store %arg3[%c0_4, %c0_5], %7 {strides = array<i32>} : memref<16x128xf32, #tpu.memory_space<vmem>>, vector<16x128xf32>,
    return
  }
  func.func @transform_0(%arg0: i32) -> (i32, i32) {
    %c0_i32 = arith.constant 0 : i32
    %c0_i32_0 = arith.constant 0 : i32
    return %arg0, %c0_i32 : i32, i32
  }
  func.func @transform_1(%arg0: i32) -> (i32, i32) {
    %c0_i32 = arith.constant 0 : i32
    %c0_i32_0 = arith.constant 0 : i32
    return %arg0, %c0_i32 : i32, i32
  }
  func.func @transform_2(%arg0: i32) -> (i32, i32) {
    %c0_i32 = arith.constant 0 : i32
    %c0_i32_0 = arith.constant 0 : i32
    return %arg0, %c0_i32 : i32, i32
  }
}

</mosaic_0001>

<bundles_post_ra>
// kernel: _lambda_.3
= control target key start
LH: loop header
LB: loop body
LE: loop exit
PB: predicated region body
PF: predicated region fallthrough
CT: control target
= control target key end

     0   :  { %7 = vsyncpa [#allocation3], 0  ;;  %s508_s0 = inlined_call_operand.vmem [shape: f32[48,256], index: 0, kind: input, shape index: {}]   ;;  %s509_s1 = inlined_call_operand.vmem [shape: f32[48,128], index: 1, kind: input, shape index: {}]   ;;  %s510_s2 = inlined_call_operand.hbm [shape: f32[48,128], index: 2, kind: output, shape index: {}]  }
   0x1   :  { %9 = vsyncpa [#allocation3 + $0x1], 0  ;;  %s421_s9 = smov 0   ;;  %s423_s10 = smov 0  }
   0x2   :  { %s425_s11 = smov 0   ;;  %s427_s12 = smov 0  }
   0x3 LB: > { %s442_s13 = sadd.s32 4294967295, %s402_s12   ;;  %s278_s14 = sadd.s32 4294967294, %s402_s12   ;;  %s402_s12 = sphi %s427_s12, %s516_s12   ;;  %s398_s11 = sphi %s425_s11, %s515_s11   ;;  %s394_s10 = sphi %s423_s10, %s514_s10   ;;  %s390_s9 = sphi %s421_s9, %s513_s9  }
   0x4   : > { %s446_s15 = sadd.s32 1, %s402_s12   ;;  %s74_s16 = sadd.s32 1, %s398_s11 }
   0x5   : > { %s71_s17 = ssub.s32 %s402_s12, %s446_s15  ;;  %p84_p0 = scmp.ne.s32.totalorder %s398_s11, %s394_s10 }
   0x6   : > { %p72_p1 = scmp.eq.s32.totalorder %s71_s17, 0  ;;  %p85_p2 = scmp.eq.s32.totalorder %s442_s13, 2 }
   0x7   : > { %p90_p3 = scmp.ne.s32.totalorder %s394_s10, %s390_s9  ;;  %p91_p4 = scmp.eq.s32.totalorder %s278_s14, 2 }
   0x8   : > { %s457_s18 = scalar_select %p72_p1, %s398_s11, %s74_s16  }
   0x9   : > { %p459_p5 = por %p85_p2, %p84_p0  ;;  %p463_p6 = por %p91_p4, %p90_p3 }
   0xa   : > { %p281_p7 = scmp.ge.s32.totalorder %s402_s12, 1  ;;  %p128_p8 = scmp.lt.s32.totalorder %s402_s12, 4 }
   0xc   : > { %p129_p9 = pnand %p281_p7, %p128_p8 }
   0xd   : > { %s283_s21 = sshll.u32 (!%p129_p9), %s442_s13, 1  ;;  %s153_s26 = sand.u32 (!%p129_p9), 1, %s394_s10  }
   0xe   : > { %132 = sbr.rel (%p129_p9) target bundleno = 43 (0x2b), region = 28  ;;  %p157_p10 = scmp.lt.s32.totalorder (!%p129_p9), %s283_s21, 5 }
   0xf   : > { %s282_s28 = sshll.u32 (!%p129_p9), %s153_s26, 4  ;;  %s294_s29 = sshll.u32 (!%p129_p9), %s442_s13, 4 }
  0x10   : > { %s200_s7 = scalar_lea.hbm (!%p129_p9), %s510_s2, %s294_s29  ;;  %s155_s8 = scalar_lea.vmem (!%p129_p9), [#allocation2], %s282_s28 }
  0x11   : > { %s201_s14 = sshll.u32 (!%p129_p9), %s155_s8, 4  ;;  %s203_s16 = sshll.u32 (!%p129_p9), %s200_s7, 4  ;;  %s202_s14 = int_to_ptr.vmem [resolvable:$true] %s201_s14  ;;  %s204_s16 = int_to_ptr.hbm [resolvable:$true] %s203_s16 }
  0x12   : > { %s189_s13 = scalar_lea.sflag (!%p129_p9), [#allocation3], %s153_s26  ;;  %s354_s17 = sshra.s32 (!%p129_p9), %s204_s16, 4  ;;  %s355_s17 = int_to_ptr.hbm [resolvable:$true] %s354_s17 }
  0x13   : > { %s518_s21 = smov (!%p157_p10, %s283_s21), 5  ;;  %s360_s24 = scalar_lea.hbm %s510_s2, 48 }
  0x14   : > { %s293_s22 = sshll.u32 %s518_s21, 4  ;;  %s287_s27 = sshll.u32 %s518_s21, 3 }
  0x15   : > { %s161_s25 = scalar_lea.vmem %s508_s0, %s293_s22  ;;  %s167_s4 = scalar_lea.vmem %s509_s1, %s287_s27 }
  0x16   : > { %v172_v0 = vld [vmem:[%s161_s25 + $0x8] sm:$0xff]  ;;  %v173_v2 = vld [vmem:[%s161_s25 + $0x18] sm:$0xff]  ;;  %v180_v5 = vld [vmem:[%s167_s4] sm:$0xff]  ;;  %s356_s21 = scalar_lea.hbm %s355_s17, 16  ;;  %p361_p0 = scmp.lt.s32.totalorder %s355_s17, %s510_s2 }
  0x17   : > { %v174_v1 = vmul.f32 1.442695, %v172_v0  ;;  %v176_v3 = vmul.f32 1.442695, %v173_v2  ;;  %v181_v8 = vld [vmem:[%s167_s4 + $0x8] sm:$0xff]  ;;  %v170_v9 = vld [vmem:[%s161_s25] sm:$0xff]  ;;  %p357_p11 = scmp.ne.s32.totalorder %s355_s17, %s356_s21  ;;  %p362_p1 = scmp.lt.s32.totalorder %s360_s24, %s356_s21 }
  0x18   : > { %v171_v12 = vld [vmem:[%s161_s25 + $0x10] sm:$0xff] }
  0x19   : > { %336 = vpow2.f32 %v174_v1  ;;  %p358_p12 = pnand %p357_p11, %p459_p5  ;;  %p363_p2 = por %p362_p1, %p361_p0 }
  0x1a   : > { %338 = vpow2.f32 %v176_v3 }
  0x1b   : > { %p359_p13 = pneg %p358_p12 }
  0x1d   : > { %p364_p3 = pnand %p363_p2, %p359_p13 }
  0x1f   : > { %v337_v4 = vpop.eup %336 }
  0x20   : > { %v339_v6 = vpop.eup %338  ;;  %v178_v7 = vmul.f32 0.5, %v337_v4 }
  0x21   : > { %v179_v10 = vmul.f32 0.5, %v339_v6 }
  0x22   : > { %v182_v11 = vmul.f32 %v180_v5, %v178_v7 }
  0x23   : > { %v183_v13 = vmul.f32 %v181_v8, %v179_v10 }
  0x24   : > { %v184_v14 = vadd.f32 %v182_v11, %v170_v9 }
  0x25   : > { %v185_v15 = vadd.f32 %v183_v13, %v171_v12 }
  0x26   : > { %186 = vst [vmem:[%s155_s8] sm:$0xff] %v184_v14 }
  0x27   : > { %187 = vst [vmem:[%s155_s8 + $0x8] sm:$0xff] %v185_v15 }
  0x28   : > { %367 = shalt.err (!%p364_p3)
}
  0x29   : > { %s404_s26 = smov 128   ;;  %s405_s28 = smov 8  }
  0x2a   : > { %295 = dma.vmem_to_hbm [thread:$0]  (%p459_p5), %s202_s14, 256, %s204_s16, %s189_s13, %s404_s26, %s404_s26, %s405_s28  }
  0x2b PF: > { %p301_p4 = scmp.ge.s32.totalorder %s402_s12, 2  ;;  %s218_s29 = sand.u32 1, %s390_s9  }
  0x2c   : > { %s219_s30 = scalar_lea.sflag [#allocation3], %s218_s29 }
  0x2d   : > { %p298_p7 = pnand %p301_p4, %p463_p6 }
  0x2f   : > { %p299_p8 = pneg %p298_p7 }
  0x31   : > { %385 = dma.done.wait (%p299_p8), %s219_s30, 256  }
  0x32   : > { %387 = vsyncadd (%p299_p8), %s219_s30, 4294967040  ;;  %p12_p9 = scmp.ge.s32.totalorder %s446_s15, 5   ;;  %s513_s9 = smov %s394_s10 }
  0x33   : > { %s514_s10 = smov %s398_s11  ;;  %s515_s11 = smov %s457_s18 }
  0x34   : > { %s516_s12 = smov %s446_s15  ;;  %14 = sbr.rel (!%p12_p9) target bundleno = 3 (0x3), region = 66 }
  0x39   :  { %225 = vsyncpa [#allocation3], 1 }
  0x3a   :  { %227 = vsyncpa [#allocation3 + $0x1], 1 }

// kernel: _lambda_.4
= control target key start
LH: loop header
LB: loop body
LE: loop exit
PB: predicated region body
PF: predicated region fallthrough
CT: control target
= control target key end

     0   :  { %7 = vsyncpa [#allocation3], 0  ;;  %s508_s0 = inlined_call_operand.vmem [shape: f32[32,256], index: 0, kind: input, shape index: {}]   ;;  %s509_s1 = inlined_call_operand.vmem [shape: f32[32,128], index: 1, kind: input, shape index: {}]   ;;  %s510_s2 = inlined_call_operand.hbm [shape: f32[32,128], index: 2, kind: output, shape index: {}]  }
   0x1   :  { %9 = vsyncpa [#allocation3 + $0x1], 0  ;;  %s421_s9 = smov 0   ;;  %s423_s10 = smov 0  }
   0x2   :  { %s425_s11 = smov 0   ;;  %s427_s12 = smov 0  }
   0x3 LB: > { %s442_s13 = sadd.s32 4294967295, %s402_s12   ;;  %s278_s14 = sadd.s32 4294967294, %s402_s12   ;;  %s402_s12 = sphi %s427_s12, %s516_s12   ;;  %s398_s11 = sphi %s425_s11, %s515_s11   ;;  %s394_s10 = sphi %s423_s10, %s514_s10   ;;  %s390_s9 = sphi %s421_s9, %s513_s9  }
   0x4   : > { %s446_s15 = sadd.s32 1, %s402_s12   ;;  %s74_s16 = sadd.s32 1, %s398_s11 }
   0x5   : > { %s71_s17 = ssub.s32 %s402_s12, %s446_s15  ;;  %p84_p0 = scmp.ne.s32.totalorder %s398_s11, %s394_s10 }
   0x6   : > { %p72_p1 = scmp.eq.s32.totalorder %s71_s17, 0  ;;  %p85_p2 = scmp.eq.s32.totalorder %s442_s13, 1 }
   0x7   : > { %p90_p3 = scmp.ne.s32.totalorder %s394_s10, %s390_s9  ;;  %p91_p4 = scmp.eq.s32.totalorder %s278_s14, 1 }
   0x8   : > { %s457_s18 = scalar_select %p72_p1, %s398_s11, %s74_s16  }
   0x9   : > { %p459_p5 = por %p85_p2, %p84_p0  ;;  %p463_p6 = por %p91_p4, %p90_p3 }
   0xa   : > { %p281_p7 = scmp.ge.s32.totalorder %s402_s12, 1  ;;  %p128_p8 = scmp.lt.s32.totalorder %s402_s12, 3 }
   0xc   : > { %p129_p9 = pnand %p281_p7, %p128_p8 }
   0xd   : > { %s283_s21 = sshll.u32 (!%p129_p9), %s442_s13, 1  ;;  %s153_s26 = sand.u32 (!%p129_p9), 1, %s394_s10  }
   0xe   : > { %132 = sbr.rel (%p129_p9) target bundleno = 43 (0x2b), region = 28  ;;  %p157_p10 = scmp.lt.s32.totalorder (!%p129_p9), %s283_s21, 3 }
   0xf   : > { %s282_s28 = sshll.u32 (!%p129_p9), %s153_s26, 4  ;;  %s294_s29 = sshll.u32 (!%p129_p9), %s442_s13, 4 }
  0x10   : > { %s200_s7 = scalar_lea.hbm (!%p129_p9), %s510_s2, %s294_s29  ;;  %s155_s8 = scalar_lea.vmem (!%p129_p9), [#allocation2], %s282_s28 }
  0x11   : > { %s201_s14 = sshll.u32 (!%p129_p9), %s155_s8, 4  ;;  %s203_s16 = sshll.u32 (!%p129_p9), %s200_s7, 4  ;;  %s202_s14 = int_to_ptr.vmem [resolvable:$true] %s201_s14  ;;  %s204_s16 = int_to_ptr.hbm [resolvable:$true] %s203_s16 }
  0x12   : > { %s189_s13 = scalar_lea.sflag (!%p129_p9), [#allocation3], %s153_s26  ;;  %s354_s17 = sshra.s32 (!%p129_p9), %s204_s16, 4  ;;  %s355_s17 = int_to_ptr.hbm [resolvable:$true] %s354_s17 }
  0x13   : > { %s518_s21 = smov (!%p157_p10, %s283_s21), 3  ;;  %s360_s24 = scalar_lea.hbm %s510_s2, 32 }
  0x14   : > { %s293_s22 = sshll.u32 %s518_s21, 4  ;;  %s287_s27 = sshll.u32 %s518_s21, 3 }
  0x15   : > { %s161_s25 = scalar_lea.vmem %s508_s0, %s293_s22  ;;  %s167_s4 = scalar_lea.vmem %s509_s1, %s287_s27 }
  0x16   : > { %v172_v0 = vld [vmem:[%s161_s25 + $0x8] sm:$0xff]  ;;  %v173_v2 = vld [vmem:[%s161_s25 + $0x18] sm:$0xff]  ;;  %v180_v5 = vld [vmem:[%s167_s4] sm:$0xff]  ;;  %s356_s21 = scalar_lea.hbm %s355_s17, 16  ;;  %p361_p0 = scmp.lt.s32.totalorder %s355_s17, %s510_s2 }
  0x17   : > { %v174_v1 = vmul.f32 1.442695, %v172_v0  ;;  %v176_v3 = vmul.f32 1.442695, %v173_v2  ;;  %v181_v8 = vld [vmem:[%s167_s4 + $0x8] sm:$0xff]  ;;  %v170_v9 = vld [vmem:[%s161_s25] sm:$0xff]  ;;  %p357_p11 = scmp.ne.s32.totalorder %s355_s17, %s356_s21  ;;  %p362_p1 = scmp.lt.s32.totalorder %s360_s24, %s356_s21 }
  0x18   : > { %v171_v12 = vld [vmem:[%s161_s25 + $0x10] sm:$0xff] }
  0x19   : > { %336 = vpow2.f32 %v174_v1  ;;  %p358_p12 = pnand %p357_p11, %p459_p5  ;;  %p363_p2 = por %p362_p1, %p361_p0 }
  0x1a   : > { %338 = vpow2.f32 %v176_v3 }
  0x1b   : > { %p359_p13 = pneg %p358_p12 }
  0x1d   : > { %p364_p3 = pnand %p363_p2, %p359_p13 }
  0x1f   : > { %v337_v4 = vpop.eup %336 }
  0x20   : > { %v339_v6 = vpop.eup %338  ;;  %v178_v7 = vmul.f32 0.5, %v337_v4 }
  0x21   : > { %v179_v10 = vmul.f32 0.5, %v339_v6 }
  0x22   : > { %v182_v11 = vmul.f32 %v180_v5, %v178_v7 }
  0x23   : > { %v183_v13 = vmul.f32 %v181_v8, %v179_v10 }
  0x24   : > { %v184_v14 = vadd.f32 %v182_v11, %v170_v9 }
  0x25   : > { %v185_v15 = vadd.f32 %v183_v13, %v171_v12 }
  0x26   : > { %186 = vst [vmem:[%s155_s8] sm:$0xff] %v184_v14 }
  0x27   : > { %187 = vst [vmem:[%s155_s8 + $0x8] sm:$0xff] %v185_v15 }
  0x28   : > { %367 = shalt.err (!%p364_p3)
}
  0x29   : > { %s404_s26 = smov 128   ;;  %s405_s28 = smov 8  }
  0x2a   : > { %295 = dma.vmem_to_hbm [thread:$0]  (%p459_p5), %s202_s14, 256, %s204_s16, %s189_s13, %s404_s26, %s404_s26, %s405_s28  }
  0x2b PF: > { %p301_p4 = scmp.ge.s32.totalorder %s402_s12, 2  ;;  %s218_s29 = sand.u32 1, %s390_s9  }
  0x2c   : > { %s219_s30 = scalar_lea.sflag [#allocation3], %s218_s29 }
  0x2d   : > { %p298_p7 = pnand %p301_p4, %p463_p6 }
  0x2f   : > { %p299_p8 = pneg %p298_p7 }
  0x31   : > { %385 = dma.done.wait (%p299_p8), %s219_s30, 256  }
  0x32   : > { %387 = vsyncadd (%p299_p8), %s219_s30, 4294967040  ;;  %p12_p9 = scmp.ge.s32.totalorder %s446_s15, 4   ;;  %s513_s9 = smov %s394_s10 }
  0x33   : > { %s514_s10 = smov %s398_s11  ;;  %s515_s11 = smov %s457_s18 }
  0x34   : > { %s516_s12 = smov %s446_s15  ;;  %14 = sbr.rel (!%p12_p9) target bundleno = 3 (0x3), region = 66 }
  0x39   :  { %225 = vsyncpa [#allocation3], 1 }
  0x3a   :  { %227 = vsyncpa [#allocation3 + $0x1], 1 }

// kernel: _lambda_.5
= control target key start
LH: loop header
LB: loop body
LE: loop exit
PB: predicated region body
PF: predicated region fallthrough
CT: control target
= control target key end

     0   :  { %s120_s0 = inlined_call_operand.vmem [shape: f32[16,256], index: 0, kind: input, shape index: {}]   ;;  %s121_s1 = inlined_call_operand.vmem [shape: f32[16,128], index: 1, kind: input, shape index: {}]   ;;  %s122_s2 = inlined_call_operand.hbm [shape: f32[16,128], index: 2, kind: output, shape index: {}]  }
   0x1   :  { %v14_v0 = vld [vmem:[%s120_s0 + $0x8] sm:$0xff]  ;;  %v15_v2 = vld [vmem:[%s120_s0 + $0x18] sm:$0xff] }
   0x2   :  { %v16_v1 = vmul.f32 1.442695, %v14_v0  ;;  %v18_v3 = vmul.f32 1.442695, %v15_v2 }
   0x3   :  { %7 = vsyncpa [#allocation3], 0  ;;  %v22_v5 = vld [vmem:[%s121_s1] sm:$0xff]  ;;  %v23_v8 = vld [vmem:[%s121_s1 + $0x8] sm:$0xff]  ;;  %s81_s19 = smov [#allocation2]   ;;  %s36_s23 = sshll.u32 %s122_s2, 4  ;;  %s37_s23 = int_to_ptr.hbm [resolvable:$true] %s36_s23 }
   0x4   :  { %51 = vpow2.f32 %v16_v1  ;;  %v12_v9 = vld [vmem:[%s120_s0] sm:$0xff]  ;;  %s34_s20 = sshll.u32 %s81_s19, 4  ;;  %v13_v12 = vld [vmem:[%s120_s0 + $0x10] sm:$0xff]  ;;  %s82_s1 = smov 128   ;;  %s35_s20 = int_to_ptr.vmem [resolvable:$true] %s34_s20 }
   0x5   :  { %53 = vpow2.f32 %v18_v3  ;;  %s83_s26 = smov 8  }
   0xa   :  { %v52_v4 = vpop.eup %51 }
   0xb   :  { %v54_v6 = vpop.eup %53  ;;  %v20_v7 = vmul.f32 0.5, %v52_v4 }
   0xc   :  { %v21_v10 = vmul.f32 0.5, %v54_v6 }
   0xd   :  { %v24_v11 = vmul.f32 %v22_v5, %v20_v7 }
   0xe   :  { %v25_v13 = vmul.f32 %v23_v8, %v21_v10 }
   0xf   :  { %v26_v14 = vadd.f32 %v24_v11, %v12_v9 }
  0x10   :  { %v27_v15 = vadd.f32 %v25_v13, %v13_v12 }
  0x11   :  { %28 = vst [vmem:[#allocation2] sm:$0xff] %v26_v14 }
  0x12   :  { %29 = vst [vmem:[#allocation2 + $0x8] sm:$0xff] %v27_v15 }
  0x13   :  { %42 = dma.vmem_to_hbm [thread:$0]  %s35_s20, 256, %s37_s23, [#allocation3], %s82_s1, %s82_s1, %s83_s26  }
  0x14   :  { %79 = dma.done.wait [#allocation3], 256  }
  0x15   :  { %80 = vsyncadd [#allocation3], 4294967040 }
  0x16   :  { %47 = vsyncpa [#allocation3], 1 }

</bundles_post_ra>
